<compile_context>
chip_gen: v7x
topology: tpu7x:2x2x1
jax: 0.10.0
libtpu: 0.0.40
codegen_flags: <defaults>
</compile_context>

<pallas_src>
import functools

import jax
import jax.numpy as jnp
from jax import lax
from jax.experimental import pallas as pl
from jax.experimental.pallas import tpu as pltpu


def _scale_norm_kernel(g_ref, x_ref, o_ref, *, eps):
    # g_ref: SMEM scalar param (shape (1,)); x_ref / o_ref: (tm, hidden) VMEM tiles.
    x = x_ref[...]
    xf = x.astype(jnp.float32)
    # Per-row sum of squares (reduction over the lane axis).
    n2 = jnp.sum(xf * xf, axis=-1, keepdims=True)                    # (tm, 1) f32
    # 1 / max(sqrt(n2), eps) == min(rsqrt(n2), 1/eps)  (n2 >= 0).
    inv = jnp.minimum(lax.rsqrt(n2), jnp.float32(1.0 / eps))
    scale = inv * g_ref[0].astype(jnp.float32)                       # fold g into per-row scale
    o_ref[...] = (xf * scale).astype(o_ref.dtype)                    # single tile-wide multiply


def _round_up(x, m):
    return (x + m - 1) // m * m


def scale_norm(x, g, eps=1e-5, tile_rows=512, vmem_budget_bytes=40 * 1024 * 1024):
    """ScaleNorm over the last dim. x: [..., hidden]; g: scalar parameter, shape (1,)."""
    orig_shape = x.shape
    hidden = orig_shape[-1]
    x2d = x.reshape(-1, hidden)
    rows = x2d.shape[0]

    # Lane-dense last dim: pad hidden to a multiple of 128. Zero columns do not
    # change the row norm; they are sliced off afterwards.
    hidden_p = _round_up(hidden, 128)
    if hidden_p != hidden:
        x2d = jnp.pad(x2d, ((0, 0), (0, hidden_p - hidden)))

    itemsize = jnp.dtype(x.dtype).itemsize
    # Double-buffered footprint: 2 x input tile + 2 x output tile.
    max_tm = vmem_budget_bytes // (4 * hidden_p * itemsize)
    max_tm = max(8, (max_tm // 8) * 8)
    tm = min(tile_rows, max_tm, _round_up(rows, 8))
    tm = max(8, (tm // 8) * 8)

    # Pad rows so the grid divides evenly (padded zero rows are computed but
    # sliced off; per-row normalization keeps valid rows exact).
    rows_p = _round_up(rows, tm)
    if rows_p != rows:
        x2d = jnp.pad(x2d, ((0, rows_p - rows), (0, 0)))

    pipeline_bytes = 4 * tm * hidden_p * itemsize
    vmem_limit = int(min(48 * 1024 * 1024,
                         max(16 * 1024 * 1024, pipeline_bytes + (4 << 20))))

    out = pl.pallas_call(
        functools.partial(_scale_norm_kernel, eps=eps),
        out_shape=jax.ShapeDtypeStruct((rows_p, hidden_p), x.dtype),
        grid_spec=pltpu.PrefetchScalarGridSpec(
            num_scalar_prefetch=0,
            grid=(rows_p // tm,),
            in_specs=[
                pl.BlockSpec(memory_space=pltpu.SMEM),             # g (scalar param)
                pl.BlockSpec((tm, hidden_p), lambda i: (i, 0)),    # x tile
            ],
            out_specs=pl.BlockSpec((tm, hidden_p), lambda i: (i, 0)),
        ),
        compiler_params=pltpu.CompilerParams(
            dimension_semantics=("parallel",),   # shards row axis across v7x's 2 TCs
            vmem_limit_bytes=vmem_limit,
        ),
    )(g, x2d)

    out = out[:rows, :hidden]
    return out.reshape(orig_shape)


def scale_norm_ref(x, g, eps=1e-5):
    n = jnp.sqrt(jnp.sum(x.astype(jnp.float32) ** 2, axis=-1, keepdims=True))
    n = jnp.maximum(n, eps)
    return (x.astype(jnp.float32) / n * g[0]).astype(x.dtype)


if __name__ == "__main__":
    key = jax.random.PRNGKey(0)
    batch, seq, hidden = 2, 8, 32
    x = jax.random.normal(key, (batch, seq, hidden), dtype=jnp.float32)

    # Deterministic parameter init (matches torch.nn.Parameter(torch.ones(1))).
    g = jnp.ones((1,), dtype=jnp.float32)

    out = scale_norm(x, g, eps=1e-5)
    out = jax.block_until_ready(out)

    ref = scale_norm_ref(x, g, eps=1e-5)
    assert out.shape == x.shape
    assert jnp.allclose(out, ref, atol=1e-5, rtol=1e-5), "mismatch vs reference"

    print("KERNEL_OK")
</pallas_src>

<mosaic_0001>
module attributes {stable_mosaic.version = 11 : i64} {
  func.func @_scale_norm_kernel(%arg0: i32, %arg1: memref<1xf32, #tpu.memory_space<smem>>, %arg2: memref<16x128xf32, #tpu.memory_space<vmem>>, %arg3: memref<16x128xf32, #tpu.memory_space<vmem>>) attributes {dimension_semantics = [#tpu.dimension_semantics<parallel>], iteration_bounds = array<i64: 1>, scalar_prefetch = 0 : i64, scratch_operands = 0 : i64, tpu.core_type = #tpu.core_type<tc>, window_params = [{transform_indices = @transform_0, window_bounds = array<i64: 1>}, {transform_indices = @transform_1, window_bounds = array<i64: 16, 128>}, {transform_indices = @transform_2, window_bounds = array<i64: 16, 128>}]} {
    %c0 = arith.constant 0 : index
    %c0_0 = arith.constant 0 : index
    %0 = vector.load %arg2[%c0, %c0_0] : memref<16x128xf32, #tpu.memory_space<vmem>>, vector<16x128xf32>
    %1 = arith.mulf %0, %0 : vector<16x128xf32>
    %cst = arith.constant dense<0.000000e+00> : vector<16xf32>
    %2 = vector.multi_reduction <add>, %1, %cst [1] : vector<16x128xf32> to vector<16xf32>
    %3 = vector.shape_cast %2 : vector<16xf32> to vector<16x1xf32>
    %4 = math.rsqrt %3 : vector<16x1xf32>
    %cst_1 = arith.constant 1.000000e+05 : f32
    %5 = vector.broadcast %cst_1 : f32 to vector<16x1xf32>
    %6 = arith.minimumf %4, %5 : vector<16x1xf32>
    %c0_2 = arith.constant 0 : index
    %7 = memref.load %arg1[%c0_2] : memref<1xf32, #tpu.memory_space<smem>>
    %8 = vector.broadcast %7 : f32 to vector<16x1xf32>
    %9 = arith.mulf %6, %8 : vector<16x1xf32>
    %10 = vector.broadcast %9 : vector<16x1xf32> to vector<16x128xf32>
    %11 = arith.mulf %0, %10 : vector<16x128xf32>
    %c0_3 = arith.constant 0 : index
    %c0_4 = arith.constant 0 : index
    %12 = vector.load %arg3[%c0_3, %c0_4] : memref<16x128xf32, #tpu.memory_space<vmem>>, vector<16x128xf32>
    tpu.vector_store %arg3[%c0_3, %c0_4], %11 {strides = array<i32>} : memref<16x128xf32, #tpu.memory_space<vmem>>, vector<16x128xf32>,
    return
  }
  func.func @transform_0(%arg0: i32) -> i32 {
    %c0_i32 = arith.constant 0 : i32
    %c0_i32_0 = arith.constant 0 : i32
    return %c0_i32 : i32
  }
  func.func @transform_1(%arg0: i32) -> (i32, i32) {
    %c0_i32 = arith.constant 0 : i32
    %c0_i32_0 = arith.constant 0 : i32
    return %arg0, %c0_i32 : i32, i32
  }
  func.func @transform_2(%arg0: i32) -> (i32, i32) {
    %c0_i32 = arith.constant 0 : i32
    %c0_i32_0 = arith.constant 0 : i32
    return %arg0, %c0_i32 : i32, i32
  }
}

</mosaic_0001>

<bundles_post_ra>
// kernel: tpu_custom_call.1
= control target key start
LH: loop header
LB: loop body
LE: loop exit
PB: predicated region body
PF: predicated region fallthrough
CT: control target
= control target key end

     0   :  { %8 = vsyncpa [#allocation4], 0  ;;  %s172_s0 = inlined_call_operand.<no memory space> [shape: f32[1], index: 0, kind: input, shape index: {}]   ;;  %s173_s1 = inlined_call_operand.hbm [shape: f32[16,128], index: 1, kind: input, shape index: {}]   ;;  %s174_s2 = inlined_call_operand.hbm [shape: f32[16,128], index: 2, kind: output, shape index: {}]  }
   0x1   :  { %9 = vsyncpa [#allocation5], 0  ;;  %s120_s9 = smov [#allocation3]   ;;  %s72_s13 = scalar_lea.hbm %s173_s1, 256 }
   0x2   :  { %s17_s10 = sshll.u32 %s120_s9, 4  ;;  %p73_p0 = scmp.ne.s32.totalorder %s173_s1, %s72_s13  ;;  %s18_s10 = int_to_ptr.vmem [resolvable:$true] %s17_s10 }
   0x3   :  { %p76_p1 = scmp.lt.u32.totalorder %s72_s13, %s173_s1 }
   0x5   :  { %p78_p2 = pnand %p76_p1, %p73_p0 }
   0x7   :  { %81 = shalt.err (!%p78_p2)
}
   0x8   :  { %s82_s18 = scalar_lea.vmem %s18_s10, 256  ;;  %p87_p4 = scmp.lt.s32.totalorder %s18_s10, %s18_s10 }
   0x9   :  { %p83_p3 = scmp.ne.s32.totalorder %s18_s10, %s82_s18  ;;  %p88_p5 = scmp.lt.s32.totalorder %s82_s18, %s82_s18 }
   0xb   :  { %p89_p6 = por %p88_p5, %p87_p4 }
   0xd   :  { %p90_p7 = pnand %p89_p6, %p83_p3 }
   0xf   :  { %93 = shalt.err (!%p90_p7)
}
  0x10   :  { %s121_s19 = smov 128   ;;  %s122_s20 = smov 8  }
  0x11   :  { %23 = dma.hbm_to_vmem [thread:$0]  %s173_s1, 256, %s18_s10, [#allocation4], %s121_s19, %s121_s19, %s122_s20  }
  0x12   :  { %116 = dma.done.wait [#allocation4], 256  }
  0x13   :  { %117 = vsyncadd [#allocation4], 4294967040  ;;  %v27_v0 = vld [vmem:[#allocation3] sm:$0xff]  ;;  %v28_v1 = vld [vmem:[#allocation3 + $0x8] sm:$0xff]  ;;  %v40_v7 = vstv %s172_s0  ;;  %s123_s1 = smov [#allocation6]  }
  0x14   :  { %v29_v2 = vmul.f32 %v27_v0, %v27_v0  ;;  %v30_v3 = vmul.f32 %v28_v1, %v28_v1  ;;  %s52_s25 = sshll.u32 %s123_s1, 4  ;;  %s53_s25 = int_to_ptr.vmem [resolvable:$true] %s52_s25 }
  0x15   :  { %s94_s26 = scalar_lea.vmem %s53_s25, 256  ;;  %p99_p9 = scmp.lt.s32.totalorder %s53_s25, %s53_s25 }
  0x16   :  { %31 = vadd.xlane.f32.xlu0 %v29_v2  ;;  %p95_p8 = scmp.ne.s32.totalorder %s53_s25, %s94_s26  ;;  %p100_p10 = scmp.lt.s32.totalorder %s94_s26, %s94_s26 }
  0x18   :  { %p101_p11 = por %p100_p10, %p99_p9 }
  0x1a   :  { %33 = vadd.xlane.f32.xlu0 %v30_v3  ;;  %p102_p12 = pnand %p101_p11, %p95_p8 }
  0xa3   :  { %v32_v4 = vpop.xlane.xlu0 %31 }
  0xa4   :  { %68 = vrsqrt.f32 %v32_v4 }
  0xa7   :  { %v34_v5 = vpop.xlane.xlu0 %33 }
  0xa8   :  { %70 = vrsqrt.f32 %v34_v5 }
  0xae   :  { %v69_v6 = vpop.eup %68 }
  0xaf   :  { %v37_v8 = vmin.f32 %v69_v6, 100000.0 }
  0xb1   :  { %v41_v9 = vmul.f32 %v40_v7, %v37_v8 }
  0xb2   :  { %v71_v10 = vpop.eup %70 }
  0xb3   :  { %v38_v11 = vmin.f32 %v71_v10, 100000.0  ;;  %v43_v12 = vmul.f32 %v41_v9, %v27_v0 }
  0xb5   :  { %v42_v13 = vmul.f32 %v40_v7, %v38_v11  ;;  %45 = vst [vmem:[#allocation6] sm:$0xff] %v43_v12 }
  0xb7   :  { %v44_v14 = vmul.f32 %v42_v13, %v28_v1 }
  0xb9   :  { %46 = vst [vmem:[#allocation6 + $0x8] sm:$0xff] %v44_v14 }
  0xba   :  { %105 = shalt.err (!%p102_p12)
}
  0xbb   :  { %s106_s28 = scalar_lea.hbm %s174_s2, 256 }
  0xbc   :  { %p107_p13 = scmp.ne.s32.totalorder %s174_s2, %s106_s28  ;;  %p110_p0 = scmp.lt.u32.totalorder %s106_s28, %s174_s2 }
  0xbe   :  { %p112_p1 = pnand %p110_p0, %p107_p13 }
  0xc0   :  { %115 = shalt.err (!%p112_p1)
}
  0xc1   :  { %58 = dma.vmem_to_hbm [thread:$0]  %s53_s25, 256, %s174_s2, [#allocation5], %s121_s19, %s121_s19, %s122_s20  }
  0xc2   :  { %118 = dma.done.wait [#allocation5], 256  }
  0xc3   :  { %119 = vsyncadd [#allocation5], 4294967040 }
  0xc4   :  { %62 = vsyncpa [#allocation4], 1 }
  0xc5   :  { %63 = vsyncpa [#allocation5], 1 }

</bundles_post_ra>
